<compile_context>
chip_gen: v7x
topology: tpu7x:2x2x1
jax: 0.10.0
libtpu: 0.0.40
codegen_flags: <defaults>
</compile_context>

<pallas_src>
import jax
import jax.numpy as jnp
from jax.experimental import pallas as pl
from jax.experimental.pallas import tpu as pltpu


def _copy_kernel(x_ref, o_ref):
    # Pure identity copy of a lane-dense tile (VMEM -> vreg -> VMEM).
    o_ref[...] = x_ref[...]


def squeeze_pallas(x, dim):
    """Equivalent of torch.squeeze(x, dim=dim) implemented with a Pallas kernel."""
    ndim = x.ndim
    dim = dim % ndim

    # torch.squeeze(x, dim) is a no-op (returns x unchanged) if that dim != 1.
    if x.shape[dim] != 1:
        return x

    out_shape = tuple(s for i, s in enumerate(x.shape) if i != dim)
    total = int(x.size)

    # Degenerate cases that do not lower usefully through pallas_call
    # (zero-size arrays, 0-d outputs): squeeze is a free metadata change.
    if total == 0 or len(out_shape) == 0:
        return jnp.squeeze(x, axis=dim)

    # Flatten to a lane-dense 2-D slab: pick the widest lane count (multiple
    # of 128, up to 1024) that divides the element count; otherwise fall back
    # to a single full-extent row (always layout-legal).
    lane = next((l for l in (1024, 512, 256, 128) if total % l == 0), total)
    rows = total // lane

    # Tile the leading axis.  512 rows x 1024 lanes of f32 = 2 MiB/buffer, so
    # double-buffered (in + out) stays well inside scoped VMEM on v5e/v6e/v7x.
    # 512 is a multiple of the 8/16/32 sublane minimums for f32/bf16/int8.
    if rows <= 512:
        block_rows = rows            # full extent -> always layout-legal
    else:
        block_rows = 512

    grid = (pl.cdiv(rows, block_rows),)
    x2d = x.reshape(rows, lane)      # metadata-only for a contiguous array

    itemsize = jnp.dtype(x.dtype).itemsize
    y2d = pl.pallas_call(
        _copy_kernel,
        out_shape=jax.ShapeDtypeStruct((rows, lane), x.dtype),
        grid=grid,
        in_specs=[pl.BlockSpec((block_rows, lane), lambda i: (i, 0))],
        out_specs=pl.BlockSpec((block_rows, lane), lambda i: (i, 0)),
        compiler_params=pltpu.CompilerParams(
            dimension_semantics=("parallel",),
        ),
        cost_estimate=pl.CostEstimate(
            flops=0,
            transcendentals=0,
            bytes_accessed=2 * total * itemsize,
        ),
    )(x2d)

    return y2d.reshape(out_shape)


if __name__ == "__main__":
    key = jax.random.PRNGKey(0)

    # Small NCHW-style input with a size-1 channel dim, squeeze dim=1:
    # [2, 1, 16, 16] -> [2, 16, 16]   (512 elems -> 1 row x 512 lanes)
    x = jax.random.normal(key, (2, 1, 16, 16), dtype=jnp.float32)
    y = jax.block_until_ready(squeeze_pallas(x, 1))
    assert y.shape == (2, 16, 16), y.shape
    assert y.dtype == x.dtype
    assert bool(jnp.array_equal(y, jnp.squeeze(x, axis=1)))

    # Slightly larger bf16 case exercising the 1024-lane slab path:
    # [4, 1, 64, 256] -> [4, 64, 256]   (65536 elems -> 64 rows x 1024 lanes)
    x2 = jax.random.normal(jax.random.PRNGKey(1), (4, 1, 64, 256),
                           dtype=jnp.bfloat16)
    y2 = jax.block_until_ready(squeeze_pallas(x2, 1))
    assert y2.shape == (4, 64, 256), y2.shape
    assert bool(jnp.array_equal(y2, jnp.squeeze(x2, axis=1)))

    # No-op case: squeezing a dim whose size != 1 returns x unchanged,
    # matching torch.squeeze(x, dim) semantics.
    x3 = jax.random.normal(jax.random.PRNGKey(2), (2, 3, 4, 4),
                           dtype=jnp.float32)
    y3 = squeeze_pallas(x3, 1)
    assert y3.shape == x3.shape
    assert bool(jnp.array_equal(y3, x3))

    print("KERNEL_OK")
</pallas_src>

<mosaic_0001>
module attributes {stable_mosaic.version = 11 : i64} {
  func.func @_copy_kernel(%arg0: i32, %arg1: memref<1x512xf32, #tpu.memory_space<vmem>>, %arg2: memref<1x512xf32, #tpu.memory_space<vmem>>) attributes {dimension_semantics = [#tpu.dimension_semantics<parallel>], iteration_bounds = array<i64: 1>, scalar_prefetch = 0 : i64, scratch_operands = 0 : i64, tpu.core_type = #tpu.core_type<tc>, window_params = [{transform_indices = @transform_0, window_bounds = array<i64: 1, 512>}, {transform_indices = @transform_1, window_bounds = array<i64: 1, 512>}]} {
    %c0 = arith.constant 0 : index
    %c0_0 = arith.constant 0 : index
    %0 = vector.load %arg1[%c0, %c0_0] : memref<1x512xf32, #tpu.memory_space<vmem>>, vector<1x512xf32>
    %c0_1 = arith.constant 0 : index
    %c0_2 = arith.constant 0 : index
    %1 = vector.load %arg2[%c0_1, %c0_2] : memref<1x512xf32, #tpu.memory_space<vmem>>, vector<1x512xf32>
    tpu.vector_store %arg2[%c0_1, %c0_2], %0 {strides = array<i32>} : memref<1x512xf32, #tpu.memory_space<vmem>>, vector<1x512xf32>,
    return
  }
  func.func @transform_0(%arg0: i32) -> (i32, i32) {
    %c0_i32 = arith.constant 0 : i32
    %c0_i32_0 = arith.constant 0 : i32
    return %arg0, %c0_i32 : i32, i32
  }
  func.func @transform_1(%arg0: i32) -> (i32, i32) {
    %c0_i32 = arith.constant 0 : i32
    %c0_i32_0 = arith.constant 0 : i32
    return %arg0, %c0_i32 : i32, i32
  }
}

</mosaic_0001>

<bundles_post_ra>
// kernel: tpu_custom_call.1
= control target key start
LH: loop header
LB: loop body
LE: loop exit
PB: predicated region body
PF: predicated region fallthrough
CT: control target
= control target key end

     0   :  { %6 = vsyncpa [#allocation3], 0  ;;  %s128_s0 = inlined_call_operand.hbm [shape: f32[1,512], index: 0, kind: input, shape index: {}]   ;;  %s129_s1 = inlined_call_operand.hbm [shape: f32[1,512], index: 1, kind: output, shape index: {}]  }
   0x1   :  { %7 = vsyncpa [#allocation4], 0  ;;  %s92_s6 = smov [#allocation2]   ;;  %s44_s10 = scalar_lea.hbm %s128_s0, 64 }
   0x2   :  { %s14_s7 = sshll.u32 %s92_s6, 4  ;;  %p45_p0 = scmp.ne.s32.totalorder %s128_s0, %s44_s10  ;;  %s15_s7 = int_to_ptr.vmem [resolvable:$true] %s14_s7 }
   0x3   :  { %p48_p1 = scmp.lt.u32.totalorder %s44_s10, %s128_s0 }
   0x5   :  { %p50_p2 = pnand %p48_p1, %p45_p0 }
   0x7   :  { %53 = shalt.err (!%p50_p2)
}
   0x8   :  { %s54_s15 = scalar_lea.vmem %s15_s7, 64  ;;  %p59_p4 = scmp.lt.s32.totalorder %s15_s7, %s15_s7 }
   0x9   :  { %p55_p3 = scmp.ne.s32.totalorder %s15_s7, %s54_s15  ;;  %p60_p5 = scmp.lt.s32.totalorder %s54_s15, %s54_s15 }
   0xb   :  { %p61_p6 = por %p60_p5, %p59_p4 }
   0xd   :  { %p62_p7 = pnand %p61_p6, %p55_p3 }
   0xf   :  { %65 = shalt.err (!%p62_p7)
}
  0x10   :  { %17 = dma.hbm_to_vmem [thread:$0]  %s128_s0, 64, %s15_s7, [#allocation3]  }
  0x11   :  { %88 = dma.done.wait [#allocation3], 64  }
  0x12   :  { %89 = vsyncadd [#allocation3], 4294967232  ;;  %v22_v0 = vlaneseq  ;;  %s93_s18 = smov [#allocation5]   ;;  %v21_v1 = vld [vmem:[#allocation2] sm:$0xf] }
  0x13   :  { %s33_s19 = sshll.u32 %s93_s18, 4  ;;  %s34_s19 = int_to_ptr.vmem [resolvable:$true] %s33_s19 }
  0x14   :  { %vm24_vm0 = vcmp.lt.s32.totalorder %v22_v0, 512  ;;  %s66_s20 = scalar_lea.vmem %s34_s19, 64  ;;  %p71_p9 = scmp.lt.s32.totalorder %s34_s19, %s34_s19 }
  0x15   :  { %26 = vst.msk [vmem:[#allocation5] sm:$0xf] %vm24_vm0, %v21_v1  ;;  %p67_p8 = scmp.ne.s32.totalorder %s34_s19, %s66_s20  ;;  %p72_p10 = scmp.lt.s32.totalorder %s66_s20, %s66_s20 }
  0x17   :  { %p73_p11 = por %p72_p10, %p71_p9 }
  0x19   :  { %p74_p12 = pnand %p73_p11, %p67_p8 }
  0x1b   :  { %77 = shalt.err (!%p74_p12)
}
  0x1c   :  { %s78_s0 = scalar_lea.hbm %s129_s1, 64 }
  0x1d   :  { %p79_p13 = scmp.ne.s32.totalorder %s129_s1, %s78_s0  ;;  %p82_p0 = scmp.lt.u32.totalorder %s78_s0, %s129_s1 }
  0x1f   :  { %p84_p1 = pnand %p82_p0, %p79_p13 }
  0x21   :  { %87 = shalt.err (!%p84_p1)
}
  0x22   :  { %36 = dma.vmem_to_hbm [thread:$0]  %s34_s19, 64, %s129_s1, [#allocation4]  }
  0x23   :  { %90 = dma.done.wait [#allocation4], 64  }
  0x24   :  { %91 = vsyncadd [#allocation4], 4294967232 }
  0x25   :  { %40 = vsyncpa [#allocation3], 1 }
  0x26   :  { %41 = vsyncpa [#allocation4], 1 }

</bundles_post_ra>
